<compile_context>
chip_gen: v7x
topology: tpu7x:2x2x1
jax: 0.10.0
libtpu: 0.0.40
codegen_flags: <defaults>
</compile_context>

<pallas_src>
import functools

import jax
import jax.numpy as jnp
from jax.experimental import pallas as pl
from jax.experimental.pallas import tpu as pltpu


# ---------------------------------------------------------------------------
# Kernel: one grid step = one (rows, Kpad) x (Kpad, Wo*Cout) matmul + epilogue.
# ---------------------------------------------------------------------------
def _basic_conv_kernel(x_ref, w_ref, b_ref, o_ref, *, apply_relu):
    """
    x_ref : (rows, Kpad)      pre-stacked KH slabs, K zero-padded     (VMEM)
    w_ref : (Kpad, Wo*Cout)   block-Toeplitz packed weights           (VMEM)
    b_ref : (1, Wo*Cout)      bias tiled over Wo                      (VMEM)
    o_ref : (rows, Wo*Cout)   lane-dense output (128-wide -> unmasked vst)
    """
    acc = jnp.dot(x_ref[...], w_ref[...], preferred_element_type=jnp.float32)
    acc = acc + b_ref[...].astype(jnp.float32)
    if apply_relu:
        acc = jnp.maximum(acc, 0.0)
    o_ref[...] = acc.astype(o_ref.dtype)


# ---------------------------------------------------------------------------
# Packing helpers (run once per layer / per call in plain JAX).
# ---------------------------------------------------------------------------
def _pack_toeplitz_weights(weight, Wp, Wo, Kpad, compute_dtype):
    """(Cout, Cin, KH, KW) -> (Kpad, Wo*Cout) block-Toeplitz along W.

    Row layout of the contraction is (kh, wp, cin); rows [KH*Wp*Cin, Kpad) are
    zero padding so the matmul K is a multiple of 256.
    """
    Cout, Cin, KH, KW = weight.shape
    w_hw = jnp.transpose(weight, (2, 3, 1, 0))                    # (KH, KW, Cin, Cout)
    kw_idx = jnp.arange(Wp)[:, None] - jnp.arange(Wo)[None, :]    # (Wp, Wo)
    valid = (kw_idx >= 0) & (kw_idx < KW)
    kw_clamped = jnp.clip(kw_idx, 0, KW - 1)
    t = w_hw[:, kw_clamped, :, :]                                 # (KH, Wp, Wo, Cin, Cout)
    t = t * valid[None, :, :, None, None].astype(w_hw.dtype)
    t = jnp.transpose(t, (0, 1, 3, 2, 4))                         # (KH, Wp, Cin, Wo, Cout)
    t = t.reshape(KH * Wp * Cin, Wo * Cout)
    t = jnp.pad(t, ((0, Kpad - KH * Wp * Cin), (0, 0)))
    return t.astype(compute_dtype)


def _pack_input_slabs(x_nhwc_padded, Ho, KH, Kpad, compute_dtype):
    """Stack the KH row-shifted slabs so the kernel does ONE matmul.

    (N, Hp, Wp, Cin) -> (N*Ho, Kpad), row (n, ho) = x_pad[n, ho:ho+KH, :, :]
    flattened as (kh, wp, cin), zero-padded to Kpad lanes.
    """
    N, Hp, Wp, Cin = x_nhwc_padded.shape
    slabs = jnp.stack([x_nhwc_padded[:, kh:kh + Ho] for kh in range(KH)],
                      axis=2)                                     # (N, Ho, KH, Wp, Cin)
    x_slab = slabs.reshape(N * Ho, KH * Wp * Cin)
    K = KH * Wp * Cin
    if Kpad > K:
        x_slab = jnp.pad(x_slab, ((0, 0), (0, Kpad - K)))
    return x_slab.astype(compute_dtype)


def _choose_batch_per_step(N, Ho, rows_target=256):
    """Smallest nb (=> most grid steps) with nb*Ho >= rows_target, nb | N,
    nb*Ho % 8 == 0 and at least 2 steps.  Otherwise one full-batch step
    (full-extent block, always legal): per-step matmul work must exceed the
    ~600-cycle per-step pipeline overhead before splitting pays."""
    for nb in range(1, N):
        if N % nb:
            continue
        if (nb * Ho) % 8:
            continue
        if nb * Ho >= rows_target and N // nb >= 2:
            return nb
    return N


# ---------------------------------------------------------------------------
# pallas_call wrapper (operates on pre-packed operands).
# ---------------------------------------------------------------------------
def _basic_conv_pallas(x_slab, w_packed, b_packed, *, rows_per_step, out_dtype,
                       apply_relu, single_buffer_invariants=False):
    M, Kpad = x_slab.shape
    _, lanes = w_packed.shape
    grid = (M // rows_per_step,)

    wb_kwargs = {}
    if single_buffer_invariants:
        # v7x / large channel counts: default double-buffering wastes VMEM on
        # grid-invariant operands; single-buffer the Toeplitz RHS and bias.
        wb_kwargs = dict(pipeline_mode=pl.Buffered(1))

    out_itemsize = jnp.dtype(out_dtype).itemsize
    # Double-buffered block footprint (worst case) + 2x headroom, capped so it
    # stays within v7x's 64 MiB physical VMEM.
    block_bytes = (2 * rows_per_step * Kpad * x_slab.dtype.itemsize
                   + 2 * rows_per_step * lanes * out_itemsize
                   + 2 * Kpad * lanes * w_packed.dtype.itemsize
                   + 2 * lanes * b_packed.dtype.itemsize)
    vmem_limit = int(min(64 * 1024 * 1024, max(16 * 1024 * 1024, 2 * block_bytes)))

    # Actual MXU work (includes the zero-padded Toeplitz K), not algorithmic
    # conv flops, so XLA schedules the surrounding layout glue sensibly.
    flops = 2 * M * Kpad * lanes
    bytes_accessed = (x_slab.size * x_slab.dtype.itemsize
                      + w_packed.size * w_packed.dtype.itemsize
                      + b_packed.size * b_packed.dtype.itemsize
                      + M * lanes * out_itemsize)

    kernel = functools.partial(_basic_conv_kernel, apply_relu=apply_relu)

    return pl.pallas_call(
        kernel,
        out_shape=jax.ShapeDtypeStruct((M, lanes), out_dtype),
        grid_spec=pltpu.PrefetchScalarGridSpec(
            num_scalar_prefetch=0,
            grid=grid,
            in_specs=[
                pl.BlockSpec((rows_per_step, Kpad), lambda i: (i, 0)),
                pl.BlockSpec((Kpad, lanes), lambda i: (0, 0), **wb_kwargs),
                pl.BlockSpec((1, lanes), lambda i: (0, 0), **wb_kwargs),
            ],
            out_specs=pl.BlockSpec((rows_per_step, lanes), lambda i: (i, 0)),
        ),
        compiler_params=pltpu.CompilerParams(
            dimension_semantics=("parallel",),
            vmem_limit_bytes=vmem_limit),
        cost_estimate=pl.CostEstimate(flops=flops, transcendentals=0,
                                      bytes_accessed=bytes_accessed),
    )(x_slab, w_packed, b_packed)


# ---------------------------------------------------------------------------
# Public API.
# ---------------------------------------------------------------------------
def make_basic_conv(weight, bias=None, *, height, width, padding=0, stride=1,
                    dilation=1, groups=1, relu=True, bn=False,
                    compute_dtype=jnp.bfloat16, batch_per_step=None,
                    single_buffer_invariants=False, nhwc=False):
    """Build a BasicConv forward fn with per-layer constants hoisted.

    Packs the Toeplitz weights / tiled bias ONCE (per-layer init), so the
    returned apply(x) only does activation packing + the Pallas matmul.
    Mirrors BasicConv(in, out, k, stride=1, padding, relu=True, bn=False,
    bias=True).forward for stride=1, dilation=1, groups=1.
    """
    assert stride == 1 and dilation == 1 and groups == 1, \
        "only stride=1 / dilation=1 / groups=1 implemented"
    assert not bn  # TODO(synk): fold BN scale/shift into weight/bias for bn=True.

    Cout, Cin, KH, KW = weight.shape
    Hp, Wp = height + 2 * padding, width + 2 * padding
    Ho, Wo = Hp - KH + 1, Wp - KW + 1
    K = KH * Wp * Cin
    # One full pass of the 256-deep v6e/v7x MXU (2x full depth on v5e) and
    # 128-aligned LHS lanes.
    Kpad = ((K + 255) // 256) * 256

    w_packed = _pack_toeplitz_weights(weight, Wp, Wo, Kpad, compute_dtype)
    if bias is None:
        bias = jnp.zeros((Cout,), jnp.float32)
    b_packed = jnp.tile(bias.astype(jnp.float32), Wo).reshape(1, Wo * Cout)

    def apply(x):
        x_nhwc = x if nhwc else jnp.transpose(x, (0, 2, 3, 1))
        N = x_nhwc.shape[0]
        assert x_nhwc.shape[1:] == (height, width, Cin)
        out_dtype = x.dtype

        xp = jnp.pad(x_nhwc,
                     ((0, 0), (padding, padding), (padding, padding), (0, 0)))
        x_slab = _pack_input_slabs(xp, Ho, KH, Kpad, compute_dtype)

        nb = (batch_per_step if batch_per_step is not None
              else _choose_batch_per_step(N, Ho))
        assert N % nb == 0
        rows_per_step = nb * Ho

        out2d = _basic_conv_pallas(
            x_slab, w_packed, b_packed, rows_per_step=rows_per_step,
            out_dtype=out_dtype, apply_relu=relu,
            single_buffer_invariants=single_buffer_invariants)

        out = out2d.reshape(N, Ho, Wo, Cout)
        return out if nhwc else jnp.transpose(out, (0, 3, 1, 2))

    return apply


def basic_conv(x, weight, bias=None, *, padding=0, relu=True,
               compute_dtype=jnp.bfloat16, **kwargs):
    """One-shot convenience wrapper.  For repeated use call make_basic_conv
    once per layer (hoists weight packing out of the hot path) and reuse /
    jit the returned apply fn."""
    N, Cin, H, W = x.shape
    fn = make_basic_conv(weight, bias, height=H, width=W, padding=padding,
                         relu=relu, compute_dtype=compute_dtype, **kwargs)
    return fn(x)


# ---------------------------------------------------------------------------
# Reference + test.
# ---------------------------------------------------------------------------
def _reference(x_nchw, weight, bias, *, padding=1, relu=True):
    out = jax.lax.conv_general_dilated(
        x_nchw, weight, window_strides=(1, 1),
        padding=[(padding, padding), (padding, padding)],
        dimension_numbers=("NCHW", "OIHW", "NCHW"))
    out = out + bias.reshape(1, -1, 1, 1)
    if relu:
        out = jnp.maximum(out, 0.0)
    return out


if __name__ == "__main__":
    key = jax.random.PRNGKey(0)
    k_x, k_w, k_b = jax.random.split(key, 3)

    # BasicConv(in_planes=4, out_planes=8, kernel_size=3, padding=1).
    N, Cin, H, W = 2, 4, 16, 16
    Cout, KH, KW = 8, 3, 3

    x = jax.random.normal(k_x, (N, Cin, H, W), dtype=jnp.float32)
    weight = jax.random.normal(k_w, (Cout, Cin, KH, KW), dtype=jnp.float32) * 0.1
    bias = jax.random.normal(k_b, (Cout,), dtype=jnp.float32) * 0.1

    ref = _reference(x, weight, bias, padding=1, relu=True)

    # f32 operands: faithful to the PyTorch module's f32 conv.
    conv_f32 = jax.jit(make_basic_conv(weight, bias, height=H, width=W,
                                       padding=1, relu=True,
                                       compute_dtype=jnp.float32))
    out = jax.block_until_ready(conv_f32(x))
    assert out.shape == ref.shape == (N, Cout, H, W)
    assert jnp.allclose(out, ref, atol=1e-4, rtol=1e-4), "f32 mismatch vs reference conv"

    # Default path: bf16 operands / f32 accumulation (native MXU path on
    # v5e/v6e/v7x), per-layer constants hoisted by make_basic_conv.
    conv_bf16 = jax.jit(make_basic_conv(weight, bias, height=H, width=W,
                                        padding=1, relu=True))
    out_bf16 = jax.block_until_ready(conv_bf16(x))
    assert jnp.allclose(out_bf16, ref, atol=5e-2, rtol=5e-2), "bf16 mismatch vs reference conv"

    print("KERNEL_OK")
</pallas_src>

<mosaic_0001>
module attributes {stable_mosaic.version = 11 : i64} {
  func.func @_basic_conv_kernel(%arg0: i32, %arg1: memref<32x256xf32, #tpu.memory_space<vmem>>, %arg2: memref<256x128xf32, #tpu.memory_space<vmem>>, %arg3: memref<1x128xf32, #tpu.memory_space<vmem>>, %arg4: memref<32x128xf32, #tpu.memory_space<vmem>>) attributes {dimension_semantics = [#tpu.dimension_semantics<parallel>], iteration_bounds = array<i64: 1>, scalar_prefetch = 0 : i64, scratch_operands = 0 : i64, tpu.core_type = #tpu.core_type<tc>, window_params = [{transform_indices = @transform_0, window_bounds = array<i64: 32, 256>}, {pipeline_mode = #tpu.pipeline_mode<synchronous>, transform_indices = @transform_1, window_bounds = array<i64: 256, 128>}, {pipeline_mode = #tpu.pipeline_mode<synchronous>, transform_indices = @transform_2, window_bounds = array<i64: 1, 128>}, {transform_indices = @transform_3, window_bounds = array<i64: 32, 128>}]} {
    %c0 = arith.constant 0 : index
    %c0_0 = arith.constant 0 : index
    %0 = vector.load %arg1[%c0, %c0_0] : memref<32x256xf32, #tpu.memory_space<vmem>>, vector<32x256xf32>
    %c0_1 = arith.constant 0 : index
    %c0_2 = arith.constant 0 : index
    %1 = vector.load %arg2[%c0_1, %c0_2] : memref<256x128xf32, #tpu.memory_space<vmem>>, vector<256x128xf32>
    %cst = arith.constant dense<0.000000e+00> : vector<32x128xf32>
    %2 = tpu.matmul %0, %1, %cst {dimension_numbers = #tpu.dot_dimension_numbers<[1], [0], [0], [1], [0, 0, 1, 1], [], []>} : vector<32x256xf32>, vector<256x128xf32>, vector<32x128xf32> -> vector<32x128xf32>
    %c0_3 = arith.constant 0 : index
    %c0_4 = arith.constant 0 : index
    %3 = vector.load %arg3[%c0_3, %c0_4] : memref<1x128xf32, #tpu.memory_space<vmem>>, vector<1x128xf32>
    %4 = vector.broadcast %3 : vector<1x128xf32> to vector<32x128xf32>
    %5 = arith.addf %2, %4 : vector<32x128xf32>
    %cst_5 = arith.constant 0.000000e+00 : f32
    %6 = vector.broadcast %cst_5 : f32 to vector<32x128xf32>
    %7 = arith.maximumf %5, %6 : vector<32x128xf32>
    %c0_6 = arith.constant 0 : index
    %c0_7 = arith.constant 0 : index
    %8 = vector.load %arg4[%c0_6, %c0_7] : memref<32x128xf32, #tpu.memory_space<vmem>>, vector<32x128xf32>
    tpu.vector_store %arg4[%c0_6, %c0_7], %7 {strides = array<i32>} : memref<32x128xf32, #tpu.memory_space<vmem>>, vector<32x128xf32>,
    return
  }
  func.func @transform_0(%arg0: i32) -> (i32, i32) {
    %c0_i32 = arith.constant 0 : i32
    %c0_i32_0 = arith.constant 0 : i32
    return %arg0, %c0_i32 : i32, i32
  }
  func.func @transform_1(%arg0: i32) -> (i32, i32) {
    %c0_i32 = arith.constant 0 : i32
    %c0_i32_0 = arith.constant 0 : i32
    %c0_i32_1 = arith.constant 0 : i32
    return %c0_i32, %c0_i32_0 : i32, i32
  }
  func.func @transform_2(%arg0: i32) -> (i32, i32) {
    %c0_i32 = arith.constant 0 : i32
    %c0_i32_0 = arith.constant 0 : i32
    %c0_i32_1 = arith.constant 0 : i32
    return %c0_i32, %c0_i32_0 : i32, i32
  }
  func.func @transform_3(%arg0: i32) -> (i32, i32) {
    %c0_i32 = arith.constant 0 : i32
    %c0_i32_0 = arith.constant 0 : i32
    return %arg0, %c0_i32 : i32, i32
  }
}

</mosaic_0001>

<bundles_post_ra>
// kernel: apply.1
= control target key start
LH: loop header
LB: loop body
LE: loop exit
PB: predicated region body
PF: predicated region fallthrough
CT: control target
= control target key end

     0   :  { %s406_s1 = inlined_call_operand.vmem [shape: f32[256,128], index: 1, kind: input, shape index: {}]   ;;  %s407_s0 = inlined_call_operand.vmem [shape: f32[32,256], index: 0, kind: input, shape index: {}]   ;;  %s408_s2 = inlined_call_operand.vmem [shape: f32[1,128], index: 2, kind: input, shape index: {}]   ;;  %s409_s3 = inlined_call_operand.vmem [shape: f32[32,128], index: 3, kind: output, shape index: {}]  }
   0x1   :  { %v38_v0 = vld [vmem:[%s406_s1 + $0x80] sm:$0xff]  ;;  %v39_v1 = vld [vmem:[%s406_s1 + $0x88] sm:$0xff]  ;;  %v40_v5 = vld [vmem:[%s406_s1 + $0x90] sm:$0xff] }
   0x2   :  { %v22_v2 = vld [vmem:[%s406_s1] sm:$0xff]  ;;  %v203_v3 = vpack.c.bf16 %v39_v1, %v38_v0  ;;  %v23_v4 = vld [vmem:[%s406_s1 + $0x8] sm:$0xff]  ;;  %v41_v6 = vld [vmem:[%s406_s1 + $0x98] sm:$0xff] }
   0x3   :  { %v205_v7 = vpack.c.bf16 %v23_v4, %v22_v2  ;;  %v207_v8 = vpack.c.bf16 %v41_v6, %v40_v5  ;;  %v24_v9 = vld [vmem:[%s406_s1 + $0x10] sm:$0xff]  ;;  %v25_v10 = vld [vmem:[%s406_s1 + $0x18] sm:$0xff]  ;;  %v42_v11 = vld [vmem:[%s406_s1 + $0xa0] sm:$0xff] }
   0x4   :  { %204 = vmatprep.subr.bf16.mxu0 %v203_v3  ;;  %235 = vmatprep.subr.bf16.mxu1 %v203_v3  ;;  %v43_v12 = vld [vmem:[%s406_s1 + $0xa8] sm:$0xff]  ;;  %v209_v13 = vpack.c.bf16 %v25_v10, %v24_v9  ;;  %v26_v15 = vld [vmem:[%s406_s1 + $0x20] sm:$0xff]  ;;  %v44_v17 = vld [vmem:[%s406_s1 + $0xb0] sm:$0xff] }
   0x5   :  { %206 = vmatpush3.bf16.msra.mxu0 %v205_v7  ;;  %243 = vmatpush3.bf16.msra.mxu1 %v205_v7  ;;  %v211_v14 = vpack.c.bf16 %v43_v12, %v42_v11  ;;  %v27_v16 = vld [vmem:[%s406_s1 + $0x28] sm:$0xff]  ;;  %v45_v18 = vld [vmem:[%s406_s1 + $0xb8] sm:$0xff]  ;;  %v28_v21 = vld [vmem:[%s406_s1 + $0x30] sm:$0xff] }
   0x6   :  { %208 = vmatprep.subr.bf16.mxu0 %v207_v8  ;;  %236 = vmatprep.subr.bf16.mxu1 %v207_v8  ;;  %v213_v19 = vpack.c.bf16 %v27_v16, %v26_v15  ;;  %v215_v20 = vpack.c.bf16 %v45_v18, %v44_v17  ;;  %v29_v22 = vld [vmem:[%s406_s1 + $0x38] sm:$0xff]  ;;  %v46_v23 = vld [vmem:[%s406_s1 + $0xc0] sm:$0xff]  ;;  %v47_v24 = vld [vmem:[%s406_s1 + $0xc8] sm:$0xff] }
   0x7   :  { %v15_v25 = vld [vmem:[%s407_s0 + $0x8] sm:$0xff]  ;;  %v217_v27 = vpack.c.bf16 %v29_v22, %v28_v21  ;;  %v219_v28 = vpack.c.bf16 %v47_v24, %v46_v23  ;;  %v30_v29 = vld [vmem:[%s406_s1 + $0x40] sm:$0xff]  ;;  %v48_v31 = vld [vmem:[%s406_s1 + $0xd0] sm:$0xff] }
   0x8   :  { %125 = vmatprep.mubr.f32.mxu0 %v15_v25  ;;  %v19_v26 = vld [vmem:[%s407_s0 + $0x28] sm:$0xff]  ;;  %v49_v32 = vld [vmem:[%s406_s1 + $0xd8] sm:$0xff]  ;;  %v32_v35 = vld [vmem:[%s406_s1 + $0x50] sm:$0xff] }
   0x9   :  { %210 = vmatpush3.bf16.msra.mxu0 %v209_v13  ;;  %244 = vmatpush3.bf16.msra.mxu1 %v209_v13  ;;  %v31_v30 = vld [vmem:[%s406_s1 + $0x48] sm:$0xff]  ;;  %v223_v34 = vpack.c.bf16 %v49_v32, %v48_v31  ;;  %v33_v36 = vld [vmem:[%s406_s1 + $0x58] sm:$0xff]  ;;  %v50_v37 = vld [vmem:[%s406_s1 + $0xe0] sm:$0xff] }
   0xa   :  { %212 = vmatprep.subr.bf16.mxu0 %v211_v14  ;;  %237 = vmatprep.subr.bf16.mxu1 %v211_v14  ;;  %v221_v33 = vpack.c.bf16 %v31_v30, %v30_v29  ;;  %v51_v38 = vld [vmem:[%s406_s1 + $0xe8] sm:$0xff]  ;;  %v225_v39 = vpack.c.bf16 %v33_v36, %v32_v35  ;;  %v34_v41 = vld [vmem:[%s406_s1 + $0x60] sm:$0xff]  ;;  %v52_v43 = vld [vmem:[%s406_s1 + $0xf0] sm:$0xff] }
   0xb   :  { %135 = vmatprep.mubr.f32.mxu1 %v19_v26  ;;  %v227_v40 = vpack.c.bf16 %v51_v38, %v50_v37  ;;  %v35_v42 = vld [vmem:[%s406_s1 + $0x68] sm:$0xff]  ;;  %v53_v44 = vld [vmem:[%s406_s1 + $0xf8] sm:$0xff]  ;;  %v36_v47 = vld [vmem:[%s406_s1 + $0x70] sm:$0xff] }
   0xc   :  { %v229_v45 = vpack.c.bf16 %v35_v42, %v34_v41  ;;  %v231_v46 = vpack.c.bf16 %v53_v44, %v52_v43  ;;  %v37_v48 = vld [vmem:[%s406_s1 + $0x78] sm:$0xff]  ;;  %v14_v50 = vld [vmem:[%s407_s0] sm:$0xff]  ;;  %v16_v54 = vld [vmem:[%s407_s0 + $0x10] sm:$0xff] }
   0xd   :  { %214 = vmatpush3.bf16.msra.mxu0 %v213_v19  ;;  %245 = vmatpush3.bf16.msra.mxu1 %v213_v19  ;;  %v233_v49 = vpack.c.bf16 %v37_v48, %v36_v47  ;;  %v18_v51 = vld [vmem:[%s407_s0 + $0x20] sm:$0xff]  ;;  %v17_v52 = vld [vmem:[%s407_s0 + $0x18] sm:$0xff]  ;;  %v20_v55 = vld [vmem:[%s407_s0 + $0x30] sm:$0xff] }
   0xe   :  { %216 = vmatprep.subr.bf16.mxu0 %v215_v20  ;;  %238 = vmatprep.subr.bf16.mxu1 %v215_v20  ;;  %v21_v53 = vld [vmem:[%s407_s0 + $0x38] sm:$0xff]  ;;  %v158_v58 = vld [vmem:[%s408_s2] ss:$0 sm:$0xff] }
  0x11   :  { %218 = vmatpush3.bf16.msra.mxu0 %v217_v27  ;;  %246 = vmatpush3.bf16.msra.mxu1 %v217_v27 }
  0x12   :  { %220 = vmatprep.subr.bf16.mxu0 %v219_v28  ;;  %239 = vmatprep.subr.bf16.mxu1 %v219_v28 }
  0x15   :  { %222 = vmatpush3.bf16.msra.mxu0 %v221_v33  ;;  %247 = vmatpush3.bf16.msra.mxu1 %v221_v33 }
  0x16   :  { %224 = vmatprep.subr.bf16.mxu0 %v223_v34  ;;  %240 = vmatprep.subr.bf16.mxu1 %v223_v34 }
  0x19   :  { %226 = vmatpush3.bf16.msra.mxu0 %v225_v39  ;;  %248 = vmatpush3.bf16.msra.mxu1 %v225_v39 }
  0x1a   :  { %228 = vmatprep.subr.bf16.mxu0 %v227_v40  ;;  %241 = vmatprep.subr.bf16.mxu1 %v227_v40 }
  0x1d   :  { %230 = vmatpush3.bf16.msra.mxu0 %v229_v45  ;;  %249 = vmatpush3.bf16.msra.mxu1 %v229_v45 }
  0x1e   :  { %232 = vmatprep.subr.bf16.mxu0 %v231_v46  ;;  %242 = vmatprep.subr.bf16.mxu1 %v231_v46 }
  0x21   :  { %234 = vmatpush3.bf16.msra.mxu0 %v233_v49  ;;  %250 = vmatpush3.bf16.msra.mxu1 %v233_v49 }
  0x24   :  { %126 = vmatmul.mubr.f32.vlgmr.msra.gmra.mrb[0].mxu0 %v14_v50  ;;  %136 = vmatmul.mubr.f32.vlgmr.msra.gmra.mrb[0].mxu1 %v18_v51 }
  0x25   :  { %130 = vmatprep.mubr.f32.mxu0 %v17_v52  ;;  %140 = vmatprep.mubr.f32.mxu1 %v21_v53 }
  0x28   :  { %131 = vmatmul.mubr.f32.gmra.mrb[2].mxu0 %v16_v54  ;;  %141 = vmatmul.mubr.f32.gmra.mrb[2].mxu1 %v20_v55 }
  0xf7   :  { %v191_v56 = vpop.f32.mrb[0].mxu0  ;;  %v197_v57 = vpop.f32.mrb[0].mxu1 }
  0xf8   :  { %v192_v59 = vpop.f32.mrb[1].mxu0  ;;  %v198_v60 = vpop.f32.mrb[1].mxu1 }
  0xf9   :  { %v193_v61 = vadd.f32 %v192_v59, %v191_v56  ;;  %v199_v62 = vadd.f32 %v198_v60, %v197_v57 }
  0xfb   :  { %v128_v63 = vadd.f32 %v193_v61, %v158_v58  ;;  %v138_v0 = vadd.f32 %v199_v62, %v158_v58  ;;  %v194_v1 = vpop.f32.mrb[2].mxu0  ;;  %v200_v2 = vpop.f32.mrb[2].mxu1 }
  0xfc   :  { %v195_v3 = vpop.f32.mrb[3].mxu0  ;;  %v201_v4 = vpop.f32.mrb[3].mxu1 }
  0xfd   :  { %v146_v5 = vmax.f32 %v128_v63, 0.0  ;;  %v148_v6 = vmax.f32 %v138_v0, 0.0  ;;  %v196_v7 = vadd.f32 %v195_v3, %v194_v1  ;;  %v202_v8 = vadd.f32 %v201_v4, %v200_v2 }
  0xff   :  { %150 = vst [vmem:[%s409_s3] sm:$0xff] %v146_v5  ;;  %152 = vst [vmem:[%s409_s3 + $0x10] sm:$0xff] %v148_v6  ;;  %v133_v9 = vadd.f32 %v196_v7, %v158_v58  ;;  %v143_v10 = vadd.f32 %v202_v8, %v158_v58 }
 0x101   :  { %v147_v11 = vmax.f32 %v133_v9, 0.0  ;;  %v149_v12 = vmax.f32 %v143_v10, 0.0 }
 0x103   :  { %151 = vst [vmem:[%s409_s3 + $0x8] sm:$0xff] %v147_v11  ;;  %153 = vst [vmem:[%s409_s3 + $0x18] sm:$0xff] %v149_v12 }

</bundles_post_ra>
